<compile_context>
chip_gen: v6e
topology: v6e:2x2x1
jax: 0.10.0
libtpu: 0.0.40
codegen_flags: <defaults>
</compile_context>

<pallas_src>
import jax
import jax.numpy as jnp
from jax import lax
from jax.experimental import pallas as pl
from jax.experimental.pallas import tpu as pltpu


def _classifier_kernel(cls_ref,
                       wih_f_ref, whh_f_ref, b_f_ref,
                       wih_b_ref, whh_b_ref, b_b_ref,
                       outw_f_ref, outw_b_ref, outb_ref,
                       o_ref,
                       gin_f, gin_b, hseq_f, hseq_b):
    B = cls_ref.shape[0]
    HS = hseq_f.shape[1]

    # dropout == identity (eval); softmax over a size-1 dim == 1.0 exactly,
    # so the AdversarialAttention branch is a no-op and `weighted == cls`.
    cls = cls_ref[...]                                            # [B, H] f32

    # ---- hoisted input-to-hidden projections (+ fused biases): [B, 4*HS] ----
    gin_f[...] = (jnp.dot(cls, wih_f_ref[...].astype(jnp.float32),
                          preferred_element_type=jnp.float32) + b_f_ref[...])
    gin_b[...] = (jnp.dot(cls, wih_b_ref[...].astype(jnp.float32),
                          preferred_element_type=jnp.float32) + b_b_ref[...])

    # hidden-to-hidden weights: convert bf16 -> f32 once, live across the loop
    whh_f = whh_f_ref[...].astype(jnp.float32)                    # [HS, 4*HS]
    whh_b = whh_b_ref[...].astype(jnp.float32)                    # [HS, 4*HS]

    def cell(gates, c):
        # gate order along the packed axis: i, f, g, o (PyTorch convention)
        i = jax.nn.sigmoid(gates[:, 0 * HS:1 * HS])
        f = jax.nn.sigmoid(gates[:, 1 * HS:2 * HS])
        g = jnp.tanh(gates[:, 2 * HS:3 * HS])
        o = jax.nn.sigmoid(gates[:, 3 * HS:4 * HS])
        c_new = f * c + i * g
        h_new = o * jnp.tanh(c_new)
        return h_new, c_new

    # ---- fused bidirectional recurrence: fwd at t, bwd at B-1-t ----
    def step(t, carry):
        h_f, c_f, h_b, c_b = carry
        tb = B - 1 - t

        g_f = gin_f[pl.ds(t, 1), :] + jnp.dot(
            h_f, whh_f, preferred_element_type=jnp.float32)       # [1, 4*HS]
        h_f, c_f = cell(g_f, c_f)
        hseq_f[pl.ds(t, 1), :] = h_f

        g_b = gin_b[pl.ds(tb, 1), :] + jnp.dot(
            h_b, whh_b, preferred_element_type=jnp.float32)       # [1, 4*HS]
        h_b, c_b = cell(g_b, c_b)
        hseq_b[pl.ds(tb, 1), :] = h_b

        return (h_f, c_f, h_b, c_b)

    zero = jnp.zeros((1, HS), jnp.float32)
    lax.fori_loop(0, B, step, (zero, zero, zero, zero), unroll=True)

    # ---- output Linear on concat([h_fwd, h_bwd], -1), split into two matmuls ----
    out = (jnp.dot(hseq_f[...], outw_f_ref[...].astype(jnp.float32),
                   preferred_element_type=jnp.float32)
           + jnp.dot(hseq_b[...], outw_b_ref[...].astype(jnp.float32),
                     preferred_element_type=jnp.float32)
           + outb_ref[...])
    o_ref[...] = out.astype(o_ref.dtype)


def roberta_large_classifier_forward(last_hidden, params,
                                     weight_dtype=jnp.bfloat16):
    # glue (plain JAX): cls slice + parameter re-layout / packing
    cls_hidden = last_hidden[:, 0, :].astype(jnp.float32)         # [B, H]
    B, H = cls_hidden.shape
    HS = params["w_hh_f"].shape[1]
    L = params["out_w"].shape[0]
    LP = ((L + 127) // 128) * 128                                 # lane-dense width

    def pack_dir(w_ih, w_hh, b_ih, b_hh):
        wih = w_ih.T.astype(weight_dtype)                         # [H, 4*HS] (i,f,g,o)
        whh = w_hh.T.astype(weight_dtype)                         # [HS, 4*HS]
        b = (b_ih + b_hh)[None, :].astype(jnp.float32)            # [1, 4*HS]
        return wih, whh, b

    wih_f, whh_f, b_f = pack_dir(params["w_ih_f"], params["w_hh_f"],
                                 params["b_ih_f"], params["b_hh_f"])
    wih_b, whh_b, b_b = pack_dir(params["w_ih_b"], params["w_hh_b"],
                                 params["b_ih_b"], params["b_hh_b"])

    out_wT = params["out_w"].T.astype(weight_dtype)               # [2*HS, L]
    out_w_f = jnp.zeros((HS, LP), weight_dtype).at[:, :L].set(out_wT[:HS])
    out_w_b = jnp.zeros((HS, LP), weight_dtype).at[:, :L].set(out_wT[HS:])
    out_b = jnp.zeros((1, LP), jnp.float32).at[:, :L].set(
        params["out_b"].astype(jnp.float32)[None, :])

    inputs = (cls_hidden, wih_f, whh_f, b_f, wih_b, whh_b, b_b,
              out_w_f, out_w_b, out_b)

    vmem_spec = pl.BlockSpec(memory_space=pltpu.MemorySpace.VMEM)
    out_padded = pl.pallas_call(
        _classifier_kernel,
        out_shape=jax.ShapeDtypeStruct((B, LP), jnp.float32),
        in_specs=[vmem_spec] * len(inputs),
        out_specs=vmem_spec,
        scratch_shapes=[pltpu.VMEM((B, 4 * HS), jnp.float32),     # gin_f
                        pltpu.VMEM((B, 4 * HS), jnp.float32),     # gin_b
                        pltpu.VMEM((B, HS), jnp.float32),         # hseq_f
                        pltpu.VMEM((B, HS), jnp.float32)],        # hseq_b
        compiler_params=pltpu.CompilerParams(
            vmem_limit_bytes=64 * 1024 * 1024),
    )(*inputs)
    return out_padded[:, :L]


def init_params(key, H, HS, L):
    ks = jax.random.split(key, 14)
    s = 0.1
    return {
        # AdversarialAttention (kept for spec fidelity; provably a no-op in fwd)
        "fc1_w": s * jax.random.normal(ks[0], (HS, H)),
        "fc1_b": s * jax.random.normal(ks[1], (HS,)),
        "fc2_w": s * jax.random.normal(ks[2], (1, HS)),
        "fc2_b": s * jax.random.normal(ks[3], (1,)),
        # LSTM forward direction (PyTorch layout [4*HS, in])
        "w_ih_f": s * jax.random.normal(ks[4], (4 * HS, H)),
        "w_hh_f": s * jax.random.normal(ks[5], (4 * HS, HS)),
        "b_ih_f": s * jax.random.normal(ks[6], (4 * HS,)),
        "b_hh_f": s * jax.random.normal(ks[7], (4 * HS,)),
        # LSTM reverse direction
        "w_ih_b": s * jax.random.normal(ks[8], (4 * HS, H)),
        "w_hh_b": s * jax.random.normal(ks[9], (4 * HS, HS)),
        "b_ih_b": s * jax.random.normal(ks[10], (4 * HS,)),
        "b_hh_b": s * jax.random.normal(ks[11], (4 * HS,)),
        # output head
        "out_w": s * jax.random.normal(ks[12], (L, 2 * HS)),
        "out_b": s * jax.random.normal(ks[13], (L,)),
    }


def reference_forward(last_hidden, params, weight_dtype=jnp.bfloat16):
    # pure-JAX reference mirroring the PyTorch forward; LSTM/out weights are
    # round-tripped through bf16 to match the kernel's weight storage dtype.
    def q(w):
        return w.astype(weight_dtype).astype(jnp.float32)

    cls = last_hidden[:, 0, :].astype(jnp.float32)
    HS = params["w_hh_f"].shape[1]

    # AdversarialAttention (softmax over a size-1 dim == 1; kept for fidelity)
    x = jax.nn.relu(cls @ params["fc1_w"].T + params["fc1_b"])
    logits = x @ params["fc2_w"].T + params["fc2_b"]
    attn = jax.nn.softmax(logits, axis=1)
    weighted = cls * attn

    def run_dir(seq, w_ih, w_hh, b_ih, b_hh):
        h = jnp.zeros((HS,), jnp.float32)
        c = jnp.zeros((HS,), jnp.float32)
        outs = []
        for t in range(seq.shape[0]):
            gates = seq[t] @ q(w_ih).T + b_ih + h @ q(w_hh).T + b_hh
            i, f, g, o = jnp.split(gates, 4)
            i = jax.nn.sigmoid(i); f = jax.nn.sigmoid(f)
            g = jnp.tanh(g); o = jax.nn.sigmoid(o)
            c = f * c + i * g
            h = o * jnp.tanh(c)
            outs.append(h)
        return jnp.stack(outs)

    hf = run_dir(weighted, params["w_ih_f"], params["w_hh_f"],
                 params["b_ih_f"], params["b_hh_f"])
    hb = run_dir(weighted[::-1], params["w_ih_b"], params["w_hh_b"],
                 params["b_ih_b"], params["b_hh_b"])[::-1]
    lstm_out = jnp.concatenate([hf, hb], axis=-1)                 # [B, 2*HS]
    return lstm_out @ q(params["out_w"]).T + params["out_b"]


if __name__ == "__main__":
    B, S, H, HS, L = 2, 8, 32, 16, 3   # batch, seq, roberta hidden, lstm hidden, labels
    key = jax.random.PRNGKey(0)
    k_act, k_par = jax.random.split(key)

    # synthetic encoder output (stands in for self.roberta(...)[0])
    last_hidden = jax.random.normal(k_act, (B, S, H), jnp.float32)
    params = init_params(k_par, H, HS, L)

    out = roberta_large_classifier_forward(last_hidden, params)
    out = jax.block_until_ready(out)

    ref = reference_forward(last_hidden, params)
    assert out.shape == (B, L)
    assert jnp.allclose(out, ref, atol=1e-4, rtol=1e-4), (out, ref)
    print("KERNEL_OK")
</pallas_src>

<mosaic_0001>
module attributes {stable_mosaic.version = 11 : i64} {
  func.func @_classifier_kernel(%arg0: memref<2x32xf32, #tpu.memory_space<vmem>>, %arg1: memref<32x64xbf16, #tpu.memory_space<vmem>>, %arg2: memref<16x64xbf16, #tpu.memory_space<vmem>>, %arg3: memref<1x64xf32, #tpu.memory_space<vmem>>, %arg4: memref<32x64xbf16, #tpu.memory_space<vmem>>, %arg5: memref<16x64xbf16, #tpu.memory_space<vmem>>, %arg6: memref<1x64xf32, #tpu.memory_space<vmem>>, %arg7: memref<16x128xbf16, #tpu.memory_space<vmem>>, %arg8: memref<16x128xbf16, #tpu.memory_space<vmem>>, %arg9: memref<1x128xf32, #tpu.memory_space<vmem>>, %arg10: memref<2x128xf32, #tpu.memory_space<vmem>>, %arg11: memref<2x64xf32, #tpu.memory_space<vmem>>, %arg12: memref<2x64xf32, #tpu.memory_space<vmem>>, %arg13: memref<2x16xf32, #tpu.memory_space<vmem>>, %arg14: memref<2x16xf32, #tpu.memory_space<vmem>>) attributes {dimension_semantics = [], scalar_prefetch = 0 : i64, scratch_operands = 4 : i64, tpu.core_type = #tpu.core_type<tc>} {
    %c0 = arith.constant 0 : index
    %c0_0 = arith.constant 0 : index
    %0 = vector.load %arg0[%c0, %c0_0] : memref<2x32xf32, #tpu.memory_space<vmem>>, vector<2x32xf32>
    %c0_1 = arith.constant 0 : index
    %c0_2 = arith.constant 0 : index
    %1 = vector.load %arg1[%c0_1, %c0_2] : memref<32x64xbf16, #tpu.memory_space<vmem>>, vector<32x64xbf16>
    %2 = arith.extf %1 : vector<32x64xbf16> to vector<32x64xf32>
    %cst = arith.constant dense<0.000000e+00> : vector<2x64xf32>
    %3 = tpu.matmul %0, %2, %cst {dimension_numbers = #tpu.dot_dimension_numbers<[1], [0], [0], [1], [0, 0, 1, 1], [], []>} : vector<2x32xf32>, vector<32x64xf32>, vector<2x64xf32> -> vector<2x64xf32>
    %c0_3 = arith.constant 0 : index
    %c0_4 = arith.constant 0 : index
    %4 = vector.load %arg3[%c0_3, %c0_4] : memref<1x64xf32, #tpu.memory_space<vmem>>, vector<1x64xf32>
    %5 = vector.broadcast %4 : vector<1x64xf32> to vector<2x64xf32>
    %6 = arith.addf %3, %5 : vector<2x64xf32>
    %c0_5 = arith.constant 0 : index
    %c0_6 = arith.constant 0 : index
    %7 = vector.load %arg11[%c0_5, %c0_6] : memref<2x64xf32, #tpu.memory_space<vmem>>, vector<2x64xf32>
    tpu.vector_store %arg11[%c0_5, %c0_6], %6 {strides = array<i32>} : memref<2x64xf32, #tpu.memory_space<vmem>>, vector<2x64xf32>,
    %c0_7 = arith.constant 0 : index
    %c0_8 = arith.constant 0 : index
    %8 = vector.load %arg4[%c0_7, %c0_8] : memref<32x64xbf16, #tpu.memory_space<vmem>>, vector<32x64xbf16>
    %9 = arith.extf %8 : vector<32x64xbf16> to vector<32x64xf32>
    %cst_9 = arith.constant dense<0.000000e+00> : vector<2x64xf32>
    %10 = tpu.matmul %0, %9, %cst_9 {dimension_numbers = #tpu.dot_dimension_numbers<[1], [0], [0], [1], [0, 0, 1, 1], [], []>} : vector<2x32xf32>, vector<32x64xf32>, vector<2x64xf32> -> vector<2x64xf32>
    %c0_10 = arith.constant 0 : index
    %c0_11 = arith.constant 0 : index
    %11 = vector.load %arg6[%c0_10, %c0_11] : memref<1x64xf32, #tpu.memory_space<vmem>>, vector<1x64xf32>
    %12 = vector.broadcast %11 : vector<1x64xf32> to vector<2x64xf32>
    %13 = arith.addf %10, %12 : vector<2x64xf32>
    %c0_12 = arith.constant 0 : index
    %c0_13 = arith.constant 0 : index
    %14 = vector.load %arg12[%c0_12, %c0_13] : memref<2x64xf32, #tpu.memory_space<vmem>>, vector<2x64xf32>
    tpu.vector_store %arg12[%c0_12, %c0_13], %13 {strides = array<i32>} : memref<2x64xf32, #tpu.memory_space<vmem>>, vector<2x64xf32>,
    %c0_14 = arith.constant 0 : index
    %c0_15 = arith.constant 0 : index
    %15 = vector.load %arg2[%c0_14, %c0_15] : memref<16x64xbf16, #tpu.memory_space<vmem>>, vector<16x64xbf16>
    %16 = arith.extf %15 : vector<16x64xbf16> to vector<16x64xf32>
    %c0_16 = arith.constant 0 : index
    %c0_17 = arith.constant 0 : index
    %17 = vector.load %arg5[%c0_16, %c0_17] : memref<16x64xbf16, #tpu.memory_space<vmem>>, vector<16x64xbf16>
    %18 = arith.extf %17 : vector<16x64xbf16> to vector<16x64xf32>
    %cst_18 = arith.constant 0.000000e+00 : f32
    %19 = vector.broadcast %cst_18 : f32 to vector<1x16xf32>
    %c0_i32 = arith.constant 0 : i32
    %c1_i32 = arith.constant 1 : i32
    %20 = arith.subi %c1_i32, %c0_i32 : i32
    %21 = arith.index_cast %c0_i32 : i32 to index
    %c0_19 = arith.constant 0 : index
    %22 = vector.load %arg11[%21, %c0_19] : memref<2x64xf32, #tpu.memory_space<vmem>>, vector<1x64xf32>
    %cst_20 = arith.constant dense<0.000000e+00> : vector<1x64xf32>
    %23 = tpu.matmul %19, %16, %cst_20 {dimension_numbers = #tpu.dot_dimension_numbers<[1], [0], [0], [1], [0, 0, 1, 1], [], []>} : vector<1x16xf32>, vector<16x64xf32>, vector<1x64xf32> -> vector<1x64xf32>
    %24 = arith.addf %22, %23 : vector<1x64xf32>
    %25 = vector.extract_strided_slice %24 {offsets = [0, 0], sizes = [1, 16], strides = [1, 1]} : vector<1x64xf32> to vector<1x16xf32>
    %26 = arith.negf %25 : vector<1x16xf32>
    %27 = math.exp %26 : vector<1x16xf32>
    %cst_21 = arith.constant 1.000000e+00 : f32
    %28 = vector.broadcast %cst_21 : f32 to vector<1x16xf32>
    %29 = arith.addf %28, %27 : vector<1x16xf32>
    %30 = arith.divf %28, %29 : vector<1x16xf32>
    %31 = vector.extract_strided_slice %24 {offsets = [0, 16], sizes = [1, 16], strides = [1, 1]} : vector<1x64xf32> to vector<1x16xf32>
    %32 = arith.negf %31 : vector<1x16xf32>
    %33 = math.exp %32 : vector<1x16xf32>
    %cst_22 = arith.constant 1.000000e+00 : f32
    %34 = vector.broadcast %cst_22 : f32 to vector<1x16xf32>
    %35 = arith.addf %34, %33 : vector<1x16xf32>
    %36 = arith.divf %34, %35 : vector<1x16xf32>
    %37 = vector.extract_strided_slice %24 {offsets = [0, 32], sizes = [1, 16], strides = [1, 1]} : vector<1x64xf32> to vector<1x16xf32>
    %38 = math.tanh %37 : vector<1x16xf32>
    %39 = vector.extract_strided_slice %24 {offsets = [0, 48], sizes = [1, 16], strides = [1, 1]} : vector<1x64xf32> to vector<1x16xf32>
    %40 = arith.negf %39 : vector<1x16xf32>
    %41 = math.exp %40 : vector<1x16xf32>
    %cst_23 = arith.constant 1.000000e+00 : f32
    %42 = vector.broadcast %cst_23 : f32 to vector<1x16xf32>
    %43 = arith.addf %42, %41 : vector<1x16xf32>
    %44 = arith.divf %42, %43 : vector<1x16xf32>
    %45 = arith.mulf %36, %19 : vector<1x16xf32>
    %46 = arith.mulf %30, %38 : vector<1x16xf32>
    %47 = arith.addf %45, %46 : vector<1x16xf32>
    %48 = math.tanh %47 : vector<1x16xf32>
    %49 = arith.mulf %44, %48 : vector<1x16xf32>
    %50 = arith.index_cast %c0_i32 : i32 to index
    %c0_24 = arith.constant 0 : index
    %51 = vector.load %arg13[%50, %c0_24] : memref<2x16xf32, #tpu.memory_space<vmem>>, vector<1x16xf32>
    tpu.vector_store %arg13[%50, %c0_24], %49 {strides = array<i32>} : memref<2x16xf32, #tpu.memory_space<vmem>>, vector<1x16xf32>,
    %52 = arith.index_cast %20 : i32 to index
    %c0_25 = arith.constant 0 : index
    %53 = vector.load %arg12[%52, %c0_25] : memref<2x64xf32, #tpu.memory_space<vmem>>, vector<1x64xf32>
    %cst_26 = arith.constant dense<0.000000e+00> : vector<1x64xf32>
    %54 = tpu.matmul %19, %18, %cst_26 {dimension_numbers = #tpu.dot_dimension_numbers<[1], [0], [0], [1], [0, 0, 1, 1], [], []>} : vector<1x16xf32>, vector<16x64xf32>, vector<1x64xf32> -> vector<1x64xf32>
    %55 = arith.addf %53, %54 : vector<1x64xf32>
    %56 = vector.extract_strided_slice %55 {offsets = [0, 0], sizes = [1, 16], strides = [1, 1]} : vector<1x64xf32> to vector<1x16xf32>
    %57 = arith.negf %56 : vector<1x16xf32>
    %58 = math.exp %57 : vector<1x16xf32>
    %cst_27 = arith.constant 1.000000e+00 : f32
    %59 = vector.broadcast %cst_27 : f32 to vector<1x16xf32>
    %60 = arith.addf %59, %58 : vector<1x16xf32>
    %61 = arith.divf %59, %60 : vector<1x16xf32>
    %62 = vector.extract_strided_slice %55 {offsets = [0, 16], sizes = [1, 16], strides = [1, 1]} : vector<1x64xf32> to vector<1x16xf32>
    %63 = arith.negf %62 : vector<1x16xf32>
    %64 = math.exp %63 : vector<1x16xf32>
    %cst_28 = arith.constant 1.000000e+00 : f32
    %65 = vector.broadcast %cst_28 : f32 to vector<1x16xf32>
    %66 = arith.addf %65, %64 : vector<1x16xf32>
    %67 = arith.divf %65, %66 : vector<1x16xf32>
    %68 = vector.extract_strided_slice %55 {offsets = [0, 32], sizes = [1, 16], strides = [1, 1]} : vector<1x64xf32> to vector<1x16xf32>
    %69 = math.tanh %68 : vector<1x16xf32>
    %70 = vector.extract_strided_slice %55 {offsets = [0, 48], sizes = [1, 16], strides = [1, 1]} : vector<1x64xf32> to vector<1x16xf32>
    %71 = arith.negf %70 : vector<1x16xf32>
    %72 = math.exp %71 : vector<1x16xf32>
    %cst_29 = arith.constant 1.000000e+00 : f32
    %73 = vector.broadcast %cst_29 : f32 to vector<1x16xf32>
    %74 = arith.addf %73, %72 : vector<1x16xf32>
    %75 = arith.divf %73, %74 : vector<1x16xf32>
    %76 = arith.mulf %67, %19 : vector<1x16xf32>
    %77 = arith.mulf %61, %69 : vector<1x16xf32>
    %78 = arith.addf %76, %77 : vector<1x16xf32>
    %79 = math.tanh %78 : vector<1x16xf32>
    %80 = arith.mulf %75, %79 : vector<1x16xf32>
    %81 = arith.index_cast %20 : i32 to index
    %c0_30 = arith.constant 0 : index
    %82 = vector.load %arg14[%81, %c0_30] : memref<2x16xf32, #tpu.memory_space<vmem>>, vector<1x16xf32>
    tpu.vector_store %arg14[%81, %c0_30], %80 {strides = array<i32>} : memref<2x16xf32, #tpu.memory_space<vmem>>, vector<1x16xf32>,
    %c1_i32_31 = arith.constant 1 : i32
    %c1_i32_32 = arith.constant 1 : i32
    %83 = arith.subi %c1_i32_32, %c1_i32_31 : i32
    %84 = arith.index_cast %c1_i32_31 : i32 to index
    %c0_33 = arith.constant 0 : index
    %85 = vector.load %arg11[%84, %c0_33] : memref<2x64xf32, #tpu.memory_space<vmem>>, vector<1x64xf32>
    %cst_34 = arith.constant dense<0.000000e+00> : vector<1x64xf32>
    %86 = tpu.matmul %49, %16, %cst_34 {dimension_numbers = #tpu.dot_dimension_numbers<[1], [0], [0], [1], [0, 0, 1, 1], [], []>} : vector<1x16xf32>, vector<16x64xf32>, vector<1x64xf32> -> vector<1x64xf32>
    %87 = arith.addf %85, %86 : vector<1x64xf32>
    %88 = vector.extract_strided_slice %87 {offsets = [0, 0], sizes = [1, 16], strides = [1, 1]} : vector<1x64xf32> to vector<1x16xf32>
    %89 = arith.negf %88 : vector<1x16xf32>
    %90 = math.exp %89 : vector<1x16xf32>
    %cst_35 = arith.constant 1.000000e+00 : f32
    %91 = vector.broadcast %cst_35 : f32 to vector<1x16xf32>
    %92 = arith.addf %91, %90 : vector<1x16xf32>
    %93 = arith.divf %91, %92 : vector<1x16xf32>
    %94 = vector.extract_strided_slice %87 {offsets = [0, 16], sizes = [1, 16], strides = [1, 1]} : vector<1x64xf32> to vector<1x16xf32>
    %95 = arith.negf %94 : vector<1x16xf32>
    %96 = math.exp %95 : vector<1x16xf32>
    %cst_36 = arith.constant 1.000000e+00 : f32
    %97 = vector.broadcast %cst_36 : f32 to vector<1x16xf32>
    %98 = arith.addf %97, %96 : vector<1x16xf32>
    %99 = arith.divf %97, %98 : vector<1x16xf32>
    %100 = vector.extract_strided_slice %87 {offsets = [0, 32], sizes = [1, 16], strides = [1, 1]} : vector<1x64xf32> to vector<1x16xf32>
    %101 = math.tanh %100 : vector<1x16xf32>
    %102 = vector.extract_strided_slice %87 {offsets = [0, 48], sizes = [1, 16], strides = [1, 1]} : vector<1x64xf32> to vector<1x16xf32>
    %103 = arith.negf %102 : vector<1x16xf32>
    %104 = math.exp %103 : vector<1x16xf32>
    %cst_37 = arith.constant 1.000000e+00 : f32
    %105 = vector.broadcast %cst_37 : f32 to vector<1x16xf32>
    %106 = arith.addf %105, %104 : vector<1x16xf32>
    %107 = arith.divf %105, %106 : vector<1x16xf32>
    %108 = arith.mulf %99, %47 : vector<1x16xf32>
    %109 = arith.mulf %93, %101 : vector<1x16xf32>
    %110 = arith.addf %108, %109 : vector<1x16xf32>
    %111 = math.tanh %110 : vector<1x16xf32>
    %112 = arith.mulf %107, %111 : vector<1x16xf32>
    %113 = arith.index_cast %c1_i32_31 : i32 to index
    %c0_38 = arith.constant 0 : index
    %114 = vector.load %arg13[%113, %c0_38] : memref<2x16xf32, #tpu.memory_space<vmem>>, vector<1x16xf32>
    tpu.vector_store %arg13[%113, %c0_38], %112 {strides = array<i32>} : memref<2x16xf32, #tpu.memory_space<vmem>>, vector<1x16xf32>,
    %115 = arith.index_cast %83 : i32 to index
    %c0_39 = arith.constant 0 : index
    %116 = vector.load %arg12[%115, %c0_39] : memref<2x64xf32, #tpu.memory_space<vmem>>, vector<1x64xf32>
    %cst_40 = arith.constant dense<0.000000e+00> : vector<1x64xf32>
    %117 = tpu.matmul %80, %18, %cst_40 {dimension_numbers = #tpu.dot_dimension_numbers<[1], [0], [0], [1], [0, 0, 1, 1], [], []>} : vector<1x16xf32>, vector<16x64xf32>, vector<1x64xf32> -> vector<1x64xf32>
    %118 = arith.addf %116, %117 : vector<1x64xf32>
    %119 = vector.extract_strided_slice %118 {offsets = [0, 0], sizes = [1, 16], strides = [1, 1]} : vector<1x64xf32> to vector<1x16xf32>
    %120 = arith.negf %119 : vector<1x16xf32>
    %121 = math.exp %120 : vector<1x16xf32>
    %cst_41 = arith.constant 1.000000e+00 : f32
    %122 = vector.broadcast %cst_41 : f32 to vector<1x16xf32>
    %123 = arith.addf %122, %121 : vector<1x16xf32>
    %124 = arith.divf %122, %123 : vector<1x16xf32>
    %125 = vector.extract_strided_slice %118 {offsets = [0, 16], sizes = [1, 16], strides = [1, 1]} : vector<1x64xf32> to vector<1x16xf32>
    %126 = arith.negf %125 : vector<1x16xf32>
    %127 = math.exp %126 : vector<1x16xf32>
    %cst_42 = arith.constant 1.000000e+00 : f32
    %128 = vector.broadcast %cst_42 : f32 to vector<1x16xf32>
    %129 = arith.addf %128, %127 : vector<1x16xf32>
    %130 = arith.divf %128, %129 : vector<1x16xf32>
    %131 = vector.extract_strided_slice %118 {offsets = [0, 32], sizes = [1, 16], strides = [1, 1]} : vector<1x64xf32> to vector<1x16xf32>
    %132 = math.tanh %131 : vector<1x16xf32>
    %133 = vector.extract_strided_slice %118 {offsets = [0, 48], sizes = [1, 16], strides = [1, 1]} : vector<1x64xf32> to vector<1x16xf32>
    %134 = arith.negf %133 : vector<1x16xf32>
    %135 = math.exp %134 : vector<1x16xf32>
    %cst_43 = arith.constant 1.000000e+00 : f32
    %136 = vector.broadcast %cst_43 : f32 to vector<1x16xf32>
    %137 = arith.addf %136, %135 : vector<1x16xf32>
    %138 = arith.divf %136, %137 : vector<1x16xf32>
    %139 = arith.mulf %130, %78 : vector<1x16xf32>
    %140 = arith.mulf %124, %132 : vector<1x16xf32>
    %141 = arith.addf %139, %140 : vector<1x16xf32>
    %142 = math.tanh %141 : vector<1x16xf32>
    %143 = arith.mulf %138, %142 : vector<1x16xf32>
    %144 = arith.index_cast %83 : i32 to index
    %c0_44 = arith.constant 0 : index
    %145 = vector.load %arg14[%144, %c0_44] : memref<2x16xf32, #tpu.memory_space<vmem>>, vector<1x16xf32>
    tpu.vector_store %arg14[%144, %c0_44], %143 {strides = array<i32>} : memref<2x16xf32, #tpu.memory_space<vmem>>, vector<1x16xf32>,
    %c2_i32 = arith.constant 2 : i32
    %c0_45 = arith.constant 0 : index
    %c0_46 = arith.constant 0 : index
    %146 = vector.load %arg13[%c0_45, %c0_46] : memref<2x16xf32, #tpu.memory_space<vmem>>, vector<2x16xf32>
    %c0_47 = arith.constant 0 : index
    %c0_48 = arith.constant 0 : index
    %147 = vector.load %arg7[%c0_47, %c0_48] : memref<16x128xbf16, #tpu.memory_space<vmem>>, vector<16x128xbf16>
    %148 = arith.extf %147 : vector<16x128xbf16> to vector<16x128xf32>
    %cst_49 = arith.constant dense<0.000000e+00> : vector<2x128xf32>
    %149 = tpu.matmul %146, %148, %cst_49 {dimension_numbers = #tpu.dot_dimension_numbers<[1], [0], [0], [1], [0, 0, 1, 1], [], []>} : vector<2x16xf32>, vector<16x128xf32>, vector<2x128xf32> -> vector<2x128xf32>
    %c0_50 = arith.constant 0 : index
    %c0_51 = arith.constant 0 : index
    %150 = vector.load %arg14[%c0_50, %c0_51] : memref<2x16xf32, #tpu.memory_space<vmem>>, vector<2x16xf32>
    %c0_52 = arith.constant 0 : index
    %c0_53 = arith.constant 0 : index
    %151 = vector.load %arg8[%c0_52, %c0_53] : memref<16x128xbf16, #tpu.memory_space<vmem>>, vector<16x128xbf16>
    %152 = arith.extf %151 : vector<16x128xbf16> to vector<16x128xf32>
    %cst_54 = arith.constant dense<0.000000e+00> : vector<2x128xf32>
    %153 = tpu.matmul %150, %152, %cst_54 {dimension_numbers = #tpu.dot_dimension_numbers<[1], [0], [0], [1], [0, 0, 1, 1], [], []>} : vector<2x16xf32>, vector<16x128xf32>, vector<2x128xf32> -> vector<2x128xf32>
    %154 = arith.addf %149, %153 : vector<2x128xf32>
    %c0_55 = arith.constant 0 : index
    %c0_56 = arith.constant 0 : index
    %155 = vector.load %arg9[%c0_55, %c0_56] : memref<1x128xf32, #tpu.memory_space<vmem>>, vector<1x128xf32>
    %156 = vector.broadcast %155 : vector<1x128xf32> to vector<2x128xf32>
    %157 = arith.addf %154, %156 : vector<2x128xf32>
    %c0_57 = arith.constant 0 : index
    %c0_58 = arith.constant 0 : index
    %158 = vector.load %arg10[%c0_57, %c0_58] : memref<2x128xf32, #tpu.memory_space<vmem>>, vector<2x128xf32>
    tpu.vector_store %arg10[%c0_57, %c0_58], %157 {strides = array<i32>} : memref<2x128xf32, #tpu.memory_space<vmem>>, vector<2x128xf32>,
    return
  }
}

</mosaic_0001>

<bundles_post_ra>
// kernel: tpu_custom_call.1
= control target key start
LH: loop header
LB: loop body
LE: loop exit
PB: predicated region body
PF: predicated region fallthrough
CT: control target
= control target key end

     0   :  { %15 = vsyncpa [#allocation7], 0  ;;  %s1414_s0 = inlined_call_operand.hbm [shape: f32[2,32], index: 0, kind: input, shape index: {}]   ;;  %s1415_s1 = inlined_call_operand.hbm [shape: bf16[32,64], index: 1, kind: input, shape index: {}]   ;;  %s1416_s2 = inlined_call_operand.hbm [shape: bf16[16,64], index: 2, kind: input, shape index: {}]   ;;  %s1417_s3 = inlined_call_operand.vmem [shape: f32[1,64], index: 3, kind: input, shape index: {}]   ;;  %s1418_s4 = inlined_call_operand.hbm [shape: bf16[32,64], index: 4, kind: input, shape index: {}]   ;;  %s1419_s5 = inlined_call_operand.vmem [shape: bf16[16,64], index: 5, kind: input, shape index: {}]   ;;  %s1420_s6 = inlined_call_operand.vmem [shape: f32[1,64], index: 6, kind: input, shape index: {}]   ;;  %s1421_s7 = inlined_call_operand.hbm [shape: bf16[16,128], index: 7, kind: input, shape index: {}]   ;;  %s1422_s8 = inlined_call_operand.hbm [shape: bf16[16,128], index: 8, kind: input, shape index: {}]   ;;  %s1423_s9 = inlined_call_operand.vmem [shape: f32[1,128], index: 9, kind: input, shape index: {}]   ;;  %s1424_s10 = inlined_call_operand.hbm [shape: f32[2,128], index: 10, kind: output, shape index: {}]  }
   0x1   :  { %16 = vsyncpa [#allocation10], 0 }
   0x2   :  { %17 = vsyncpa [#allocation13], 0 }
   0x3   :  { %18 = vsyncpa [#allocation16], 0 }
   0x4   :  { %19 = vsyncpa [#allocation8], 0  ;;  %s1234_s13 = smov [#allocation9]  }
   0x5   :  { %s35_s14 = sshll.u32 %s1234_s13, 4  ;;  %s36_s14 = int_to_ptr.vmem [resolvable:$true] %s35_s14 }
   0x6   :  { %s1092_s15 = scalar_lea.vmem %s36_s14, 256  ;;  %p1097_p1 = scmp.lt.s32.totalorder %s36_s14, %s36_s14 }
   0x7   :  { %p1093_p0 = scmp.ne.s32.totalorder %s36_s14, %s1092_s15  ;;  %p1098_p2 = scmp.lt.s32.totalorder %s1092_s15, %s1092_s15 }
   0x9   :  { %p1099_p3 = por %p1098_p2, %p1097_p1 }
   0xb   :  { %p1100_p4 = pnand %p1099_p3, %p1093_p0 }
   0xd   :  { %1103 = shalt.err (!%p1100_p4)
}
   0xe   :  { %s1235_s16 = smov 64   ;;  %s1236_s17 = smov 4  }
   0xf   :  { %41 = dma.hbm_to_vmem [thread:$0]  %s1415_s1, 256, %s36_s14, [#allocation10], %s1235_s16, %s1235_s16, %s1236_s17  }
  0x10   :  { %s1237_s20 = smov [#allocation12]   ;;  %s1238_s22 = smov [#allocation6]  }
  0x11   :  { %s61_s21 = sshll.u32 %s1237_s20, 4  ;;  %s26_s23 = sshll.u32 %s1238_s22, 4  ;;  %s62_s21 = int_to_ptr.vmem [resolvable:$true] %s61_s21  ;;  %s27_s23 = int_to_ptr.vmem [resolvable:$true] %s26_s23 }
  0x12   :  { %s1112_s24 = scalar_lea.vmem %s62_s21, 256  ;;  %p1117_p6 = scmp.lt.s32.totalorder %s62_s21, %s62_s21 }
  0x13   :  { %p1113_p5 = scmp.ne.s32.totalorder %s62_s21, %s1112_s24  ;;  %p1118_p7 = scmp.lt.s32.totalorder %s1112_s24, %s1112_s24 }
  0x15   :  { %p1119_p8 = por %p1118_p7, %p1117_p6 }
  0x17   :  { %p1120_p9 = pnand %p1119_p8, %p1113_p5 }
  0x19   :  { %1123 = shalt.err (!%p1120_p9)
}
  0x1a   :  { %67 = dma.hbm_to_vmem [thread:$0]  %s1418_s4, 256, %s62_s21, [#allocation13], %s1235_s16, %s1235_s16, %s1236_s17  }
  0x1b   :  { %s1132_s1 = scalar_lea.vmem %s27_s23, 32  ;;  %p1137_p11 = scmp.lt.s32.totalorder %s27_s23, %s27_s23 }
  0x1c   :  { %p1133_p10 = scmp.ne.s32.totalorder %s27_s23, %s1132_s1  ;;  %p1138_p12 = scmp.lt.s32.totalorder %s1132_s1, %s1132_s1 }
  0x1e   :  { %p1139_p13 = por %p1138_p12, %p1137_p11 }
  0x20   :  { %p1140_p0 = pnand %p1139_p13, %p1133_p10 }
  0x22   :  { %1143 = shalt.err (!%p1140_p0)
}
  0x23   :  { %29 = dma.hbm_to_vmem [thread:$0]  %s1414_s0, 32, %s27_s23, [#allocation7]  }
  0x24   :  { %s1239_s29 = smov [#allocation11]   ;;  %s1240_s11 = smov [#allocation14]  }
  0x25   :  { %s47_s30 = sshll.u32 %s1239_s29, 4  ;;  %s77_s12 = sshll.u32 %s1240_s11, 4  ;;  %s48_s30 = int_to_ptr.vmem [resolvable:$true] %s47_s30  ;;  %s78_s12 = int_to_ptr.vmem [resolvable:$true] %s77_s12 }
  0x26   :  { %s1152_s13 = scalar_lea.vmem %s48_s30, 128  ;;  %p1157_p2 = scmp.lt.s32.totalorder %s48_s30, %s48_s30 }
  0x27   :  { %p1153_p1 = scmp.ne.s32.totalorder %s48_s30, %s1152_s13  ;;  %p1158_p3 = scmp.lt.s32.totalorder %s1152_s13, %s1152_s13 }
  0x29   :  { %p1159_p4 = por %p1158_p3, %p1157_p2 }
  0x2b   :  { %p1160_p5 = pnand %p1159_p4, %p1153_p1 }
  0x2d   :  { %1163 = shalt.err (!%p1160_p5)
}
  0x2e   :  { %53 = dma.hbm_to_vmem [thread:$0]  %s1416_s2, 128, %s48_s30, [#allocation10], %s1235_s16, %s1235_s16, %s1236_s17  }
  0x2f   :  { %s1172_s0 = scalar_lea.vmem %s78_s12, 128  ;;  %p1177_p7 = scmp.lt.s32.totalorder %s78_s12, %s78_s12 }
  0x30   :  { %p1173_p6 = scmp.ne.s32.totalorder %s78_s12, %s1172_s0  ;;  %p1178_p8 = scmp.lt.s32.totalorder %s1172_s0, %s1172_s0 }
  0x32   :  { %p1179_p9 = por %p1178_p8, %p1177_p7 }
  0x34   :  { %p1180_p10 = pnand %p1179_p9, %p1173_p6 }
  0x36   :  { %1183 = shalt.err (!%p1180_p10)
}
  0x37   :  { %83 = dma.hbm_to_vmem [thread:$0]  %s1421_s7, 128, %s78_s12, [#allocation13], %s1235_s16, %s1235_s16, %s1236_s17  }
  0x38   :  { %s1241_s19 = smov [#allocation15]  }
  0x39   :  { %s89_s20 = sshll.u32 %s1241_s19, 4  ;;  %s90_s20 = int_to_ptr.vmem [resolvable:$true] %s89_s20 }
  0x3a   :  { %s1192_s21 = scalar_lea.vmem %s90_s20, 128  ;;  %p1197_p12 = scmp.lt.s32.totalorder %s90_s20, %s90_s20 }
  0x3b   :  { %p1193_p11 = scmp.ne.s32.totalorder %s90_s20, %s1192_s21  ;;  %p1198_p13 = scmp.lt.s32.totalorder %s1192_s21, %s1192_s21 }
  0x3d   :  { %p1199_p0 = por %p1198_p13, %p1197_p12 }
  0x3f   :  { %p1200_p1 = pnand %p1199_p0, %p1193_p11 }
  0x41   :  { %1203 = shalt.err (!%p1200_p1)
}
  0x42   :  { %95 = dma.hbm_to_vmem [thread:$0]  %s1422_s8, 128, %s90_s20, [#allocation16], %s1235_s16, %s1235_s16, %s1236_s17  }
  0x43   :  { %1224 = dma.done.wait [#allocation7], 32  }
  0x44   :  { %1225 = vsyncadd [#allocation7], 4294967264 }
  0x45   :  { %1226 = dma.done.wait [#allocation10], 384  }
  0x46   :  { %1227 = vsyncadd [#allocation10], 4294966912 }
  0x47   :  { %1228 = dma.done.wait [#allocation13], 384  }
  0x48   :  { %1229 = vsyncadd [#allocation13], 4294966912 }
  0x49   :  { %1230 = dma.done.wait [#allocation16], 128  }
  0x4a   :  { %1231 = vsyncadd [#allocation16], 4294967168  ;;  %v1242_v0 = vmov 0.0   ;;  %vm1243_vm0 = vmmov 0   ;;  %v943_v1 = vld [vmem:[#allocation9 + $0x8] sm:$0xff]   ;;  %v944_v2 = vld [vmem:[#allocation12 + $0x8] sm:$0xff]  }
  0x4b   :  { %973 = vmatprep.subr.mxu0 %v1242_v0  ;;  %984 = vmatprep.subr.mxu1 %v1242_v0  ;;  %v912_v3 = vld [vmem:[#allocation9] sm:$0xff]   ;;  %v917_v4 = vunpack.c.l.bf16 %v943_v1  ;;  %v918_v5 = vunpack.c.h.bf16 %v943_v1  ;;  %v925_v6 = vunpack.c.l.bf16 %v944_v2  ;;  %v926_v7 = vunpack.c.h.bf16 %v944_v2  ;;  %v920_v8 = vld [vmem:[#allocation12] sm:$0xff]   ;;  %v928_v13 = vld [vmem:[#allocation11] sm:$0xff]   ;;  %s1246_s24 = smov 32   ;;  %s1247_s25 = smov 80  }
  0x4c   :  { %981 = vmatprep.mubr.msk.f32.mxu0 %vm1243_vm0, %v1242_v0  ;;  %992 = vmatprep.mubr.msk.f32.mxu1 %vm1243_vm0, %v1242_v0  ;;  %v914_v9 = vunpack.c.h.bf16 %v912_v3  ;;  %v922_v10 = vunpack.c.h.bf16 %v920_v8  ;;  %v913_v11 = vunpack.c.l.bf16 %v912_v3  ;;  %v921_v12 = vunpack.c.l.bf16 %v920_v8  ;;  %v932_v14 = vld [vmem:[%s1419_s5] sm:$0xff]   ;;  %v116_v15 = vld [vmem:[#allocation6] sm:$0x3]  ;;  %s1248_s27 = smov [#allocation17]  }
  0x4d   :  { %974 = vmatpush3.msra.mxu0 %v918_v5  ;;  %985 = vmatpush3.msra.mxu1 %v926_v7  ;;  %vm132_vm1 = vcmask 261120   ;;  %v930_v16 = vunpack.c.h.bf16 %v928_v13  ;;  %v934_v17 = vunpack.c.h.bf16 %v932_v14  ;;  %v929_v18 = vunpack.c.l.bf16 %v928_v13  ;;  %v898_v20 = vld [vmem:[%s1417_s3] ss:$0 sm:$0xff]  ;;  %s1244_s3 = smov 96   ;;  %s886_s28 = sshll.u32 %s1248_s27, 4  ;;  %s887_s28 = int_to_ptr.vmem [resolvable:$true] %s886_s28 }
  0x4e   :  { %975 = vmatprep.subr.mxu0 %v1242_v0  ;;  %986 = vmatprep.subr.mxu1 %v1242_v0  ;;  %v933_v19 = vunpack.c.l.bf16 %v932_v14  ;;  %v900_v21 = vld [vmem:[%s1420_s6] ss:$0 sm:$0xff]  ;;  %vm206_vm2 = vcmask 517120   ;;  %s1245_s6 = smov 16   ;;  %vm406_vm3 = vcmask 122880   ;;  %vm303_vm4 = vcmask 130048   ;;  %p1209_p3 = scmp.lt.s32.totalorder %s887_s28, %s887_s28 }
  0x4f   :  { %976 = vmatpush3.msra.mxu0 %v917_v4  ;;  %987 = vmatpush3.msra.mxu1 %v925_v6  ;;  %s1204_s29 = scalar_lea.vmem %s887_s28, 32 }
  0x50   :  { %977 = vmatprep.subr.mxu0 %v1242_v0  ;;  %988 = vmatprep.subr.mxu1 %v1242_v0  ;;  %p1205_p2 = scmp.ne.s32.totalorder %s887_s28, %s1204_s29  ;;  %p1210_p4 = scmp.lt.s32.totalorder %s1204_s29, %s1204_s29 }
  0x51   :  { %978 = vmatpush3.msra.mxu0 %v914_v9  ;;  %989 = vmatpush3.msra.mxu1 %v922_v10 }
  0x52   :  { %979 = vmatprep.subr.mxu0 %v1242_v0  ;;  %990 = vmatprep.subr.mxu1 %v1242_v0  ;;  %p1211_p5 = por %p1210_p4, %p1209_p3 }
  0x53   :  { %980 = vmatpush3.msra.mxu0 %v913_v11  ;;  %991 = vmatpush3.msra.mxu1 %v921_v12 }
  0x54   :  { %982 = vmatmul.mubr.msk.f32.vlgmr.msra.gmra.mxu0 %vm132_vm1, %v116_v15  ;;  %993 = vmatmul.mubr.msk.f32.vlgmr.msra.gmra.mxu1 %vm132_vm1, %v116_v15  ;;  %p1212_p6 = pnand %p1211_p5, %p1205_p2 }
  0x55   :  { %995 = vmatprep.subr.mxu0 %v1242_v0  ;;  %999 = vmatprep.mubr.msk.f32.mxu0 %vm1243_vm0, %v1242_v0 }
  0x56   :  { %996 = vmatpush3.msra.mxu0 %v930_v16  ;;  %1002 = vmatprep.subr.mxu1 %v1242_v0 }
  0x57   :  { %997 = vmatprep.subr.mxu0 %v1242_v0  ;;  %1003 = vmatpush3.msra.mxu1 %v934_v17 }
  0x58   :  { %998 = vmatpush3.msra.mxu0 %v929_v18  ;;  %1004 = vmatprep.subr.mxu1 %v1242_v0 }
  0x59   :  { %1000 = vmatmul.mubr.f32.vlgmr.msra.gmra.mxu0 %v1242_v0  ;;  %1005 = vmatpush3.msra.mxu1 %v933_v19 }
  0x5a   :  { %1006 = vmatprep.mubr.msk.f32.mxu1 %vm1243_vm0, %v1242_v0  ;;  %1009 = vmatprep.subr.mxu0 %v1242_v0 }
  0x5b   :  { %1007 = vmatmul.mubr.f32.vlgmr.msra.gmra.mxu1 %v1242_v0  ;;  %1010 = vmatpush3.msra.mxu0 %v930_v16 }
  0x5c   :  { %1011 = vmatprep.subr.mxu0 %v1242_v0  ;;  %1013 = vmatprep.mubr.msk.f32.mxu0 %vm1243_vm0, %v1242_v0 }
  0x5d   :  { %1012 = vmatpush3.msra.mxu0 %v929_v18  ;;  %1016 = vmatprep.subr.mxu1 %v1242_v0 }
  0x5e   :  { %1017 = vmatpush3.msra.mxu1 %v934_v17  ;;  %1020 = vmatprep.mubr.msk.f32.mxu1 %vm1243_vm0, %v1242_v0 }
  0x5f   :  { %1018 = vmatprep.subr.mxu1 %v1242_v0  ;;  %1023 = vmatprep.subr.mxu0 %v1242_v0 }
  0x60   :  { %1019 = vmatpush3.msra.mxu1 %v933_v19 }
  0x61   :  { %1030 = vmatprep.subr.mxu1 %v1242_v0 }
 0x114   :  { %v202_v22 = vpop.f32.mrf.mxu0  ;;  %v289_v23 = vpop.f32.mrf.mxu1 }
 0x115   :  { %v203_v24 = vadd.f32 %v898_v20, %v202_v22  ;;  %v290_v25 = vadd.f32 %v900_v21, %v289_v23 }
 0x116   :  { %v983_v26 = vpop.f32.mrf.mxu0  ;;  %v994_v27 = vpop.f32.mrf.mxu1 }
 0x117   :  { %207 = vst.msk [vmem:[#allocation2] sm:$0x3] %vm206_vm2, %v203_v24  ;;  %293 = vst.msk [vmem:[#allocation3] sm:$0x3] %vm206_vm2, %v290_v25 }
 0x119   :  { %v373_v28 = vpop.f32.mrf.mxu0 }
 0x11b   :  { %v1001_v29 = vpop.f32.mrf.mxu0  ;;  %v475_v30 = vpop.f32.mrf.mxu1 }
 0x11d   :  { %v1008_v31 = vpop.f32.mrf.mxu1 }
 0x11e   :  { %v302_v32 = vld [vmem:[#allocation2] sm:$0x1]  ;;  %v408_v33 = vld [vmem:[#allocation3 + $0x1] sm:$0x1]  ;;  %v509_v1 = vld [vmem:[#allocation2 + $0x1] sm:$0x1] }
 0x11f   :  { %v377_v34 = vadd.f32 %v373_v28, %v302_v32  ;;  %v479_v35 = vadd.f32 %v475_v30, %v408_v33  ;;  %v612_v5 = vld [vmem:[#allocation3] sm:$0x1]  ;;  %v936_v31 = vld [vmem:[#allocation14] sm:$0xff]  }
 0x120   :  { %v938_v32 = vunpack.c.h.bf16 %v936_v31  ;;  %v937_v33 = vunpack.c.l.bf16 %v936_v31 }
 0x121   :  { %1052 = vtanh.f32 %v377_v34  ;;  %v902_v38 = vmul.f32 -1.442695, %v377_v34  ;;  %v903_v39 = vmul.f32 -1.442695, %v479_v35  ;;  %v940_v34 = vld [vmem:[#allocation15] sm:$0xff]  }
 0x122   :  { %1054 = vtanh.f32 %v479_v35  ;;  %v942_v35 = vunpack.c.h.bf16 %v940_v34 }
 0x123   :  { %1056 = vpow2.f32 %v902_v38 }
 0x124   :  { %1058 = vpow2.f32 %v903_v39 }
 0x12e   :  { %v1053_v36 = vpop.eup %1052 }
 0x12f   :  { %387 = vrot.lane.b32.xlu0 %v1053_v36, %s1244_s3  ;;  %v1055_v37 = vpop.eup %1054  ;;  %v941_v36 = vunpack.c.l.bf16 %v940_v34 }
 0x130   :  { %v1057_v40 = vpop.eup %1056 }
 0x131   :  { %v381_v41 = vadd.f32 1.0, %v1057_v40  ;;  %v1059_v42 = vpop.eup %1058 }
 0x132   :  { %v483_v43 = vadd.f32 1.0, %v1059_v42 }
 0x133   :  { %489 = vrot.lane.b32.xlu0 %v1055_v37, %s1244_s3  ;;  %1060 = vrcp.f32 %v381_v41 }
 0x134   :  { %1062 = vrcp.f32 %v483_v43 }
 0x140   :  { %v1061_v44 = vpop.eup %1060 }
 0x141   :  { %v1063_v47 = vpop.eup %1062  ;;  %v385_v50 = vmul.f32 0.0, %v1061_v44 }
 0x142   :  { %v487_v53 = vmul.f32 0.0, %v1063_v47 }
 0x1a1   :  { %v388_v45 = vpop.permute.xlu0 %387 }
 0x1a2   :  { %v390_v46 = vmul.f32 %v1061_v44, %v388_v45 }
 0x1a4   :  { %392 = vrot.lane.b32.xlu1 %v390_v46, %s1245_s6 }
 0x1a5   :  { %v490_v48 = vpop.permute.xlu0 %489 }
 0x1a6   :  { %v492_v49 = vmul.f32 %v1063_v47, %v490_v48 }
 0x1a8   :  { %494 = vrot.lane.b32.xlu1 %v492_v49, %s1245_s6 }
 0x216   :  { %v393_v51 = vpop.permute.xlu1 %392 }
 0x217   :  { %v395_v52 = vadd.f32 %v393_v51, %v385_v50 }
 0x219   :  { %1064 = vtanh.f32 %v395_v52 }
 0x21a   :  { %v495_v54 = vpop.permute.xlu1 %494 }
 0x21b   :  { %v497_v55 = vadd.f32 %v495_v54, %v487_v53 }
 0x21d   :  { %1066 = vtanh.f32 %v497_v55 }
 0x226   :  { %v1065_v56 = vpop.eup %1064 }
 0x227   :  { %398 = vrot.lane.b32.xlu0 %v1065_v56, %s1246_s24 }
 0x22a   :  { %v1067_v57 = vpop.eup %1066 }
 0x22b   :  { %500 = vrot.lane.b32.xlu1 %v1067_v57, %s1246_s24 }
 0x299   :  { %v399_v58 = vpop.permute.xlu0 %398 }
 0x29a   :  { %v401_v59 = vmul.f32 %v1061_v44, %v399_v58 }
 0x29c   :  { %403 = vrot.lane.b32.xlu0 %v401_v59, %s1247_s25 }
 0x29d   :  { %v501_v60 = vpop.permute.xlu1 %500 }
 0x29e   :  { %v503_v61 = vmul.f32 %v1063_v47, %v501_v60  ;;  %v910_v47 = vld [vmem:[%s1423_s9] ss:$0 sm:$0xff] }
 0x2a0   :  { %505 = vrot.lane.b32.xlu1 %v503_v61, %s1247_s25 }
 0x30e   :  { %v404_v62 = vpop.permute.xlu0 %403 }
 0x30f   :  { %407 = vst.msk [vmem:[#allocation4] sm:$0x1] %vm406_vm3, %v404_v62  ;;  %1014 = vmatmul.mubr.msk.f32.vlgmr.msra.gmra.mxu0 %vm303_vm4, %v404_v62 }
 0x310   :  { %1027 = vmatprep.mubr.msk.f32.mxu0 %vm1243_vm0, %v1242_v0  ;;  %1024 = vmatpush3.msra.mxu0 %v942_v35 }
 0x311   :  { %1025 = vmatprep.subr.mxu0 %v1242_v0 }
 0x312   :  { %v506_v63 = vpop.permute.xlu1 %505  ;;  %1026 = vmatpush3.msra.mxu0 %v941_v36 }
 0x313   :  { %508 = vst.msk [vmem:[#allocation5 + $0x1] sm:$0x1] %vm406_vm3, %v506_v63  ;;  %1021 = vmatmul.mubr.msk.f32.vlgmr.msra.gmra.mxu1 %vm303_vm4, %v506_v63 }
 0x314   :  { %1034 = vmatprep.mubr.msk.f32.mxu1 %vm1243_vm0, %v1242_v0  ;;  %1031 = vmatpush3.msra.mxu1 %v938_v32 }
 0x315   :  { %1032 = vmatprep.subr.mxu1 %v1242_v0 }
 0x316   :  { %1033 = vmatpush3.msra.mxu1 %v937_v33 }
 0x3cf   :  { %v578_v2 = vpop.f32.mrf.mxu0 }
 0x3d0   :  { %v582_v3 = vadd.f32 %v578_v2, %v509_v1 }
 0x3d1   :  { %v1015_v4 = vpop.f32.mrf.mxu0 }
 0x3d2   :  { %1068 = vtanh.f32 %v582_v3  ;;  %v905_v11 = vmul.f32 -1.442695, %v582_v3 }
 0x3d3   :  { %v681_v6 = vpop.f32.mrf.mxu1 }
 0x3d4   :  { %v685_v7 = vadd.f32 %v681_v6, %v612_v5 }
 0x3d5   :  { %v1022_v8 = vpop.f32.mrf.mxu1 }
 0x3d6   :  { %1070 = vtanh.f32 %v685_v7  ;;  %v907_v12 = vmul.f32 -1.442695, %v685_v7 }
 0x3d7   :  { %1072 = vpow2.f32 %v905_v11 }
 0x3d8   :  { %1074 = vpow2.f32 %v907_v12 }
 0x3df   :  { %v1069_v9 = vpop.eup %1068 }
 0x3e0   :  { %592 = vrot.lane.b32.xlu0 %v1069_v9, %s1244_s3 }
 0x3e3   :  { %v1071_v10 = vpop.eup %1070 }
 0x3e4   :  { %695 = vrot.lane.b32.xlu1 %v1071_v10, %s1244_s3  ;;  %v1073_v13 = vpop.eup %1072 }
 0x3e5   :  { %v586_v14 = vadd.f32 1.0, %v1073_v13  ;;  %v1075_v15 = vpop.eup %1074 }
 0x3e6   :  { %v689_v16 = vadd.f32 1.0, %v1075_v15 }
 0x3e7   :  { %1076 = vrcp.f32 %v586_v14 }
 0x3e8   :  { %1078 = vrcp.f32 %v689_v16 }
 0x3f4   :  { %v1077_v17 = vpop.eup %1076 }
 0x3f5   :  { %v1079_v20 = vpop.eup %1078  ;;  %v590_v23 = vmul.f32 %v1077_v17, %v395_v52 }
 0x3f6   :  { %v693_v26 = vmul.f32 %v1079_v20, %v497_v55 }
 0x452   :  { %v593_v18 = vpop.permute.xlu0 %592 }
 0x453   :  { %v595_v19 = vmul.f32 %v1077_v17, %v593_v18 }
 0x455   :  { %597 = vrot.lane.b32.xlu0 %v595_v19, %s1245_s6 }
 0x456   :  { %v696_v21 = vpop.permute.xlu1 %695 }
 0x457   :  { %v698_v22 = vmul.f32 %v1079_v20, %v696_v21 }
 0x459   :  { %700 = vrot.lane.b32.xlu1 %v698_v22, %s1245_s6 }
 0x4c7   :  { %v598_v24 = vpop.permute.xlu0 %597 }
 0x4c8   :  { %v600_v25 = vadd.f32 %v598_v24, %v590_v23 }
 0x4ca   :  { %1080 = vtanh.f32 %v600_v25 }
 0x4cb   :  { %v701_v27 = vpop.permute.xlu1 %700 }
 0x4cc   :  { %v703_v28 = vadd.f32 %v701_v27, %v693_v26 }
 0x4ce   :  { %1082 = vtanh.f32 %v703_v28 }
 0x4d7   :  { %v1081_v29 = vpop.eup %1080 }
 0x4d8   :  { %603 = vrot.lane.b32.xlu0 %v1081_v29, %s1246_s24 }
 0x4db   :  { %v1083_v30 = vpop.eup %1082 }
 0x4dc   :  { %706 = vrot.lane.b32.xlu1 %v1083_v30, %s1246_s24 }
 0x54a   :  { %v604_v37 = vpop.permute.xlu0 %603 }
 0x54b   :  { %v606_v38 = vmul.f32 %v1077_v17, %v604_v37 }
 0x54d   :  { %608 = vrot.lane.b32.xlu0 %v606_v38, %s1247_s25 }
 0x54e   :  { %v707_v39 = vpop.permute.xlu1 %706 }
 0x54f   :  { %v709_v40 = vmul.f32 %v1079_v20, %v707_v39 }
 0x551   :  { %711 = vrot.lane.b32.xlu1 %v709_v40, %s1247_s25 }
 0x5bf   :  { %v609_v41 = vpop.permute.xlu0 %608 }
 0x5c0   :  { %611 = vst.msk [vmem:[#allocation4 + $0x1] sm:$0x1] %vm406_vm3, %v609_v41 }
 0x5c3   :  { %v712_v42 = vpop.permute.xlu1 %711 }
 0x5c4   :  { %714 = vst.msk [vmem:[#allocation5] sm:$0x1] %vm406_vm3, %v712_v42 }
 0x5c7   :  { %v715_v43 = vld [vmem:[#allocation4] sm:$0x3] }
 0x5c8   :  { %1035 = vmatmul.mubr.msk.f32.vlgmr.msra.gmra.mxu1 %vm303_vm4, %v715_v43 }
 0x5cb   :  { %v720_v0 = vld [vmem:[#allocation5] sm:$0x3] }
 0x5cc   :  { %1028 = vmatmul.mubr.msk.f32.vlgmr.msra.gmra.mxu0 %vm303_vm4, %v720_v0 }
 0x688   :  { %v867_v44 = vpop.f32.mrf.mxu1 }
 0x68a   :  { %v1036_v45 = vpop.f32.mrf.mxu1 }
 0x68c   :  { %v794_v46 = vpop.f32.mrf.mxu0 }
 0x68d   :  { %v868_v48 = vadd.f32 %v867_v44, %v794_v46 }
 0x68e   :  { %v1029_v49 = vpop.f32.mrf.mxu0 }
 0x68f   :  { %v878_v50 = vadd.f32 %v910_v47, %v868_v48 }
 0x691   :  { %879 = vst [vmem:[#allocation17] sm:$0x3] %v878_v50 }
 0x692   :  { %1215 = shalt.err (!%p1212_p6)
}
 0x693   :  { %889 = dma.vmem_to_hbm [thread:$0]  %s887_s28, 32, %s1424_s10, [#allocation8]  }
 0x694   :  { %1232 = dma.done.wait [#allocation8], 32  }
 0x695   :  { %1233 = vsyncadd [#allocation8], 4294967264 }
 0x696   :  { %893 = vsyncpa [#allocation7], 1 }
 0x697   :  { %894 = vsyncpa [#allocation10], 1 }
 0x698   :  { %895 = vsyncpa [#allocation13], 1 }
 0x699   :  { %896 = vsyncpa [#allocation16], 1 }
 0x69a   :  { %897 = vsyncpa [#allocation8], 1 }

</bundles_post_ra>
